<compile_context>
chip_gen: v5e
topology: v5e:2x2
jax: 0.10.0
libtpu: 0.0.40
codegen_flags: <defaults>
</compile_context>

<pallas_src>
import jax
import jax.numpy as jnp
from jax import lax
from jax.experimental import pallas as pl
from jax.experimental.pallas import tpu as pltpu


# ----------------------------- Pallas kernel --------------------------------
def make_basic_block_kernel(C_PAD, TILE_L, shifts, compute_dtype):
    # shifts[t] is the circular lane roll that realizes tap t's spatial offset
    # (jnp.roll semantics: result[j] = x[j - shift], so shift = -delta mod TILE_L).

    def kernel(x_ref, mask_ref, w1_ref, b1_ref, w2_ref, b2_ref,
               out_ref, patch_ref, y1_ref):
        # ---- conv1: stack 9 rolled copies along K, one (C_PAD, 9*C_PAD)@(9*C_PAD, L)
        #      matmul, + bias (BN1 scale folded into w1), Hardtanh(0,20), mask restores
        #      the zero conv-pad ring / lane-pad tail.
        x_val = x_ref[...]                                        # (C_PAD, TILE_L)
        for t, s in enumerate(shifts):
            blk = x_val if s == 0 else pltpu.roll(x_val, shift=s, axis=1)
            patch_ref[t * C_PAD:(t + 1) * C_PAD, :] = blk
        acc1 = jnp.dot(w1_ref[...], patch_ref[...],
                       preferred_element_type=jnp.float32)        # (C_PAD, TILE_L) f32
        y1 = jnp.clip(acc1 + b1_ref[...], 0.0, 20.0) * mask_ref[...]
        y1_ref[...] = y1.astype(compute_dtype)

        # ---- conv2 (BN2 scale folded) + identity residual + Hardtanh(0,20) ----
        y1_val = y1_ref[...]
        for t, s in enumerate(shifts):
            blk = y1_val if s == 0 else pltpu.roll(y1_val, shift=s, axis=1)
            patch_ref[t * C_PAD:(t + 1) * C_PAD, :] = blk
        acc2 = jnp.dot(w2_ref[...], patch_ref[...],
                       preferred_element_type=jnp.float32)
        residual = x_val.astype(jnp.float32)
        out_ref[...] = jnp.clip(acc2 + b2_ref[...] + residual, 0.0, 20.0)

    return kernel


# ------------------------------- glue / setup -------------------------------
def basic_block(x_nchw, params, compute_dtype=jnp.bfloat16, eps=1e-5):
    N, C, H, W = x_nchw.shape
    w1, w2 = params['w1'], params['w2']
    Cout = w1.shape[0]
    assert Cout == C and w2.shape == (C, C, 3, 3), \
        "identity-residual path requires inplanes == planes (stride=1, no downsample)"

    Q, P = H + 2, W + 2                       # zero-padded spatial grid
    QP = Q * P
    QPpad = ((QP + 127) // 128) * 128         # lane-dense per-image stride
    if QPpad - QP < P + 1:                    # tail zeros must absorb the +/-(P+1) wrap
        QPpad += 128
    assert QPpad % 128 == 0 and QPpad - QP >= P + 1
    C_PAD = max(16, ((C + 15) // 16) * 16)
    L = N * QPpad
    itm = jnp.dtype(compute_dtype).itemsize

    # ---- per-generation VMEM budget -> lane tile (whole images per grid step) ----
    try:
        vmem_cap = int(pltpu.get_tpu_info().vmem_capacity_bytes)
    except Exception:
        vmem_cap = 64 * 1024 * 1024           # conservative (v7x-sized) fallback
    vmem_limit = int(vmem_cap * 3 // 4)
    # resident bytes/lane: x (2 bufs) + f32 out (2 bufs) + patch scratch + y1 scratch
    bytes_per_lane = C_PAD * itm * 2 + C_PAD * 4 * 2 + 9 * C_PAD * itm + C_PAD * itm + 8
    fixed = 2 * (C_PAD * 9 * C_PAD * itm) * 2 + 4 * C_PAD * 4 + (1 << 20)
    budget = max(QPpad * bytes_per_lane, vmem_limit // 2 - fixed)
    max_imgs = max(1, budget // (bytes_per_lane * QPpad))

    divisors = [d for d in range(1, N + 1) if N % d == 0 and d <= max_imgs] or [1]
    imgs_per_tile = divisors[-1]              # biggest tile that fits the VMEM budget
    for d in divisors:                        # prefer >=2 grid steps (megacore/pipeline)
        if N // d >= 2 and d * QPpad >= 256:
            imgs_per_tile = d
            break
    TILE_L = imgs_per_tile * QPpad
    n_tiles = N // imgs_per_tile

    # ---- layout: NCHW -> channel-major slab (C_PAD, L) over the zero-padded,
    #      flattened per-image spatial grid (lane tail zero-padded to QPpad). ----
    x = x_nchw.astype(jnp.float32)
    xp = jnp.pad(x, ((0, 0), (0, C_PAD - C), (1, 1), (1, 1)))        # (N, C_PAD, Q, P)
    xp = jnp.pad(xp.reshape(N, C_PAD, QP), ((0, 0), (0, 0), (0, QPpad - QP)))
    x2d = jnp.transpose(xp, (1, 0, 2)).reshape(C_PAD, L).astype(compute_dtype)

    # interior mask for ONE lane tile (tiles are whole images, so it is identical for
    # every grid step -> constant block index, fetched once).
    pidx = jnp.arange(QPpad)
    yy, xx = pidx // P, pidx % P
    m = ((pidx < QP) & (yy >= 1) & (yy <= H) & (xx >= 1) & (xx <= W)).astype(jnp.float32)
    mask = jnp.tile(m, (imgs_per_tile,)).reshape(1, TILE_L)

    def fold(w_oihw, g, b, mean, var):
        # Fold BN scale into the conv weights (constant transform); keep only the bias.
        s = g / jnp.sqrt(var + eps)
        bias = b - mean * s
        wt = jnp.transpose(w_oihw, (2, 3, 0, 1)) * s[None, None, :, None]  # (3,3,O,I)
        wt = jnp.pad(wt, ((0, 0), (0, 0), (0, C_PAD - Cout), (0, C_PAD - C)))
        wt = wt.reshape(9, C_PAD, C_PAD)
        # (C_PAD, 9*C_PAD): column t*C_PAD + cin matches patch row t*C_PAD + cin.
        w_stk = jnp.transpose(wt, (1, 0, 2)).reshape(C_PAD, 9 * C_PAD).astype(compute_dtype)
        bp = jnp.pad(bias, (0, C_PAD - Cout)).reshape(C_PAD, 1).astype(jnp.float32)
        return w_stk, bp

    w1f, b1f = fold(w1, params['g1'], params['be1'], params['m1'], params['v1'])
    w2f, b2f = fold(w2, params['g2'], params['be2'], params['m2'], params['v2'])

    # tap t = dy*3+dx reads the padded grid at lane offset delta=(dy-1)*P+(dx-1);
    # with roll semantics result[j] = x[j - shift] -> shift = -delta (mod TILE_L).
    shifts = [(-((dy - 1) * P + (dx - 1))) % TILE_L
              for dy in range(3) for dx in range(3)]

    kernel = make_basic_block_kernel(C_PAD, TILE_L, shifts, compute_dtype)
    out2d = pl.pallas_call(
        kernel,
        out_shape=jax.ShapeDtypeStruct((C_PAD, L), jnp.float32),
        grid_spec=pltpu.PrefetchScalarGridSpec(
            num_scalar_prefetch=0,
            grid=(n_tiles,),
            in_specs=[
                pl.BlockSpec((C_PAD, TILE_L), lambda i: (0, i)),          # x slab
                pl.BlockSpec((1, TILE_L), lambda i: (0, 0)),              # interior mask
                pl.BlockSpec((C_PAD, 9 * C_PAD), lambda i: (0, 0)),       # w1 (stacked)
                pl.BlockSpec((C_PAD, 1), lambda i: (0, 0)),               # b1
                pl.BlockSpec((C_PAD, 9 * C_PAD), lambda i: (0, 0)),       # w2 (stacked)
                pl.BlockSpec((C_PAD, 1), lambda i: (0, 0)),               # b2
            ],
            out_specs=pl.BlockSpec((C_PAD, TILE_L), lambda i: (0, i)),
            scratch_shapes=[
                pltpu.VMEM((9 * C_PAD, TILE_L), compute_dtype),   # stacked tap slab
                pltpu.VMEM((C_PAD, TILE_L), compute_dtype),       # y1
            ],
        ),
        compiler_params=pltpu.CompilerParams(
            dimension_semantics=("parallel",),
            vmem_limit_bytes=vmem_limit,
        ),
    )(x2d, mask, w1f, b1f, w2f, b2f)

    out = out2d.reshape(C_PAD, N, QPpad)[:C, :, :QP].reshape(C, N, Q, P)
    out = out[:, :, 1:H + 1, 1:W + 1]                 # drop the pad ring -> (C, N, H, W)
    return jnp.transpose(out, (1, 0, 2, 3))           # back to NCHW


# ------------------------------ pure-JAX reference ---------------------------
def basic_block_ref(x_nchw, params, eps=1e-5):
    """Literal f32 translation of the PyTorch BasicBlock forward (inference-mode BN)."""
    x = jnp.transpose(x_nchw, (0, 2, 3, 1)).astype(jnp.float32)

    def conv(v, w_oihw):
        w = jnp.transpose(w_oihw, (2, 3, 1, 0))  # HWIO
        return lax.conv_general_dilated(v, w, (1, 1), 'SAME',
                                        dimension_numbers=('NHWC', 'HWIO', 'NHWC'))

    def bn(v, g, b, m, var):
        return (v - m) / jnp.sqrt(var + eps) * g + b

    out = conv(x, params['w1'])
    out = bn(out, params['g1'], params['be1'], params['m1'], params['v1'])
    out = jnp.clip(out, 0.0, 20.0)
    out = conv(out, params['w2'])
    out = bn(out, params['g2'], params['be2'], params['m2'], params['v2'])
    out = jnp.clip(out + x, 0.0, 20.0)
    return jnp.transpose(out, (0, 3, 1, 2))


# ----------------------------------- main ------------------------------------
if __name__ == "__main__":
    N, C, H, W = 2, 4, 16, 16          # inplanes = planes = 4, stride = 1
    key = jax.random.PRNGKey(0)
    ks = jax.random.split(key, 11)

    params = {
        'w1':  0.2 * jax.random.normal(ks[0], (C, C, 3, 3), jnp.float32),
        'w2':  0.2 * jax.random.normal(ks[1], (C, C, 3, 3), jnp.float32),
        'g1':  jax.random.uniform(ks[2], (C,), jnp.float32, 0.8, 1.2),
        'be1': 0.1 * jax.random.normal(ks[3], (C,), jnp.float32),
        'm1':  0.1 * jax.random.normal(ks[4], (C,), jnp.float32),
        'v1':  jax.random.uniform(ks[5], (C,), jnp.float32, 0.8, 1.2),
        'g2':  jax.random.uniform(ks[6], (C,), jnp.float32, 0.8, 1.2),
        'be2': 0.1 * jax.random.normal(ks[7], (C,), jnp.float32),
        'm2':  0.1 * jax.random.normal(ks[8], (C,), jnp.float32),
        'v2':  jax.random.uniform(ks[9], (C,), jnp.float32, 0.8, 1.2),
    }
    x = jax.random.normal(ks[10], (N, C, H, W), jnp.float32)

    ref = jax.block_until_ready(basic_block_ref(x, params))

    # Exact-correctness gate: f32 compute path vs the PyTorch-equivalent reference.
    out_f32 = jax.block_until_ready(basic_block(x, params, compute_dtype=jnp.float32))
    assert out_f32.shape == (N, C, H, W)
    err32 = float(jnp.max(jnp.abs(out_f32 - ref)))
    assert jnp.allclose(out_f32, ref, atol=1e-4, rtol=1e-4), f"f32 max abs err {err32}"

    # Fast path: bf16 activations/weights/scratch with f32 accumulation; residual is the
    # bf16 input cast back to f32 (~2^-8 relative rounding), covered by the tolerance.
    out_bf16 = jax.block_until_ready(basic_block(x, params, compute_dtype=jnp.bfloat16))
    errbf = float(jnp.max(jnp.abs(out_bf16 - ref)))
    assert jnp.allclose(out_bf16, ref, atol=2e-1, rtol=5e-2), f"bf16 max abs err {errbf}"

    print("KERNEL_OK")
</pallas_src>

<mosaic_0001>
module attributes {stable_mosaic.version = 11 : i64} {
  func.func @kernel(%arg0: i32, %arg1: memref<16x384xf32, #tpu.memory_space<vmem>>, %arg2: memref<1x384xf32, #tpu.memory_space<vmem>>, %arg3: memref<16x144xf32, #tpu.memory_space<vmem>>, %arg4: memref<16x1xf32, #tpu.memory_space<vmem>>, %arg5: memref<16x144xf32, #tpu.memory_space<vmem>>, %arg6: memref<16x1xf32, #tpu.memory_space<vmem>>, %arg7: memref<16x384xf32, #tpu.memory_space<vmem>>, %arg8: memref<144x384xf32, #tpu.memory_space<vmem>>, %arg9: memref<16x384xf32, #tpu.memory_space<vmem>>) attributes {dimension_semantics = [#tpu.dimension_semantics<parallel>], iteration_bounds = array<i64: 2>, scalar_prefetch = 0 : i64, scratch_operands = 2 : i64, tpu.core_type = #tpu.core_type<tc>, window_params = [{transform_indices = @transform_0, window_bounds = array<i64: 16, 384>}, {pipeline_mode = #tpu.pipeline_mode<synchronous>, transform_indices = @transform_1, window_bounds = array<i64: 1, 384>}, {pipeline_mode = #tpu.pipeline_mode<synchronous>, transform_indices = @transform_2, window_bounds = array<i64: 16, 144>}, {pipeline_mode = #tpu.pipeline_mode<synchronous>, transform_indices = @transform_3, window_bounds = array<i64: 16, 1>}, {pipeline_mode = #tpu.pipeline_mode<synchronous>, transform_indices = @transform_4, window_bounds = array<i64: 16, 144>}, {pipeline_mode = #tpu.pipeline_mode<synchronous>, transform_indices = @transform_5, window_bounds = array<i64: 16, 1>}, {transform_indices = @transform_6, window_bounds = array<i64: 16, 384>}]} {
    %c0 = arith.constant 0 : index
    %c0_0 = arith.constant 0 : index
    %0 = vector.load %arg1[%c0, %c0_0] : memref<16x384xf32, #tpu.memory_space<vmem>>, vector<16x384xf32>
    %c19_i32 = arith.constant 19 : i32
    %1 = tpu.dynamic_rotate %0 by %c19_i32 dim 1 : vector<16x384xf32>, i32 -> vector<16x384xf32>
    %c0_1 = arith.constant 0 : index
    %c0_2 = arith.constant 0 : index
    %2 = vector.load %arg8[%c0_1, %c0_2] : memref<144x384xf32, #tpu.memory_space<vmem>>, vector<16x384xf32>
    tpu.vector_store %arg8[%c0_1, %c0_2], %1 {strides = array<i32>} : memref<144x384xf32, #tpu.memory_space<vmem>>, vector<16x384xf32>,
    %c18_i32 = arith.constant 18 : i32
    %3 = tpu.dynamic_rotate %0 by %c18_i32 dim 1 : vector<16x384xf32>, i32 -> vector<16x384xf32>
    %c16 = arith.constant 16 : index
    %c0_3 = arith.constant 0 : index
    %4 = vector.load %arg8[%c16, %c0_3] : memref<144x384xf32, #tpu.memory_space<vmem>>, vector<16x384xf32>
    tpu.vector_store %arg8[%c16, %c0_3], %3 {strides = array<i32>} : memref<144x384xf32, #tpu.memory_space<vmem>>, vector<16x384xf32>,
    %c17_i32 = arith.constant 17 : i32
    %5 = tpu.dynamic_rotate %0 by %c17_i32 dim 1 : vector<16x384xf32>, i32 -> vector<16x384xf32>
    %c32 = arith.constant 32 : index
    %c0_4 = arith.constant 0 : index
    %6 = vector.load %arg8[%c32, %c0_4] : memref<144x384xf32, #tpu.memory_space<vmem>>, vector<16x384xf32>
    tpu.vector_store %arg8[%c32, %c0_4], %5 {strides = array<i32>} : memref<144x384xf32, #tpu.memory_space<vmem>>, vector<16x384xf32>,
    %c1_i32 = arith.constant 1 : i32
    %7 = tpu.dynamic_rotate %0 by %c1_i32 dim 1 : vector<16x384xf32>, i32 -> vector<16x384xf32>
    %c48 = arith.constant 48 : index
    %c0_5 = arith.constant 0 : index
    %8 = vector.load %arg8[%c48, %c0_5] : memref<144x384xf32, #tpu.memory_space<vmem>>, vector<16x384xf32>
    tpu.vector_store %arg8[%c48, %c0_5], %7 {strides = array<i32>} : memref<144x384xf32, #tpu.memory_space<vmem>>, vector<16x384xf32>,
    %c64 = arith.constant 64 : index
    %c0_6 = arith.constant 0 : index
    %9 = vector.load %arg8[%c64, %c0_6] : memref<144x384xf32, #tpu.memory_space<vmem>>, vector<16x384xf32>
    tpu.vector_store %arg8[%c64, %c0_6], %0 {strides = array<i32>} : memref<144x384xf32, #tpu.memory_space<vmem>>, vector<16x384xf32>,
    %c383_i32 = arith.constant 383 : i32
    %10 = tpu.dynamic_rotate %0 by %c383_i32 dim 1 : vector<16x384xf32>, i32 -> vector<16x384xf32>
    %c80 = arith.constant 80 : index
    %c0_7 = arith.constant 0 : index
    %11 = vector.load %arg8[%c80, %c0_7] : memref<144x384xf32, #tpu.memory_space<vmem>>, vector<16x384xf32>
    tpu.vector_store %arg8[%c80, %c0_7], %10 {strides = array<i32>} : memref<144x384xf32, #tpu.memory_space<vmem>>, vector<16x384xf32>,
    %c367_i32 = arith.constant 367 : i32
    %12 = tpu.dynamic_rotate %0 by %c367_i32 dim 1 : vector<16x384xf32>, i32 -> vector<16x384xf32>
    %c96 = arith.constant 96 : index
    %c0_8 = arith.constant 0 : index
    %13 = vector.load %arg8[%c96, %c0_8] : memref<144x384xf32, #tpu.memory_space<vmem>>, vector<16x384xf32>
    tpu.vector_store %arg8[%c96, %c0_8], %12 {strides = array<i32>} : memref<144x384xf32, #tpu.memory_space<vmem>>, vector<16x384xf32>,
    %c366_i32 = arith.constant 366 : i32
    %14 = tpu.dynamic_rotate %0 by %c366_i32 dim 1 : vector<16x384xf32>, i32 -> vector<16x384xf32>
    %c112 = arith.constant 112 : index
    %c0_9 = arith.constant 0 : index
    %15 = vector.load %arg8[%c112, %c0_9] : memref<144x384xf32, #tpu.memory_space<vmem>>, vector<16x384xf32>
    tpu.vector_store %arg8[%c112, %c0_9], %14 {strides = array<i32>} : memref<144x384xf32, #tpu.memory_space<vmem>>, vector<16x384xf32>,
    %c365_i32 = arith.constant 365 : i32
    %16 = tpu.dynamic_rotate %0 by %c365_i32 dim 1 : vector<16x384xf32>, i32 -> vector<16x384xf32>
    %c128 = arith.constant 128 : index
    %c0_10 = arith.constant 0 : index
    %17 = vector.load %arg8[%c128, %c0_10] : memref<144x384xf32, #tpu.memory_space<vmem>>, vector<16x384xf32>
    tpu.vector_store %arg8[%c128, %c0_10], %16 {strides = array<i32>} : memref<144x384xf32, #tpu.memory_space<vmem>>, vector<16x384xf32>,
    %c0_11 = arith.constant 0 : index
    %c0_12 = arith.constant 0 : index
    %18 = vector.load %arg3[%c0_11, %c0_12] : memref<16x144xf32, #tpu.memory_space<vmem>>, vector<16x144xf32>
    %c0_13 = arith.constant 0 : index
    %c0_14 = arith.constant 0 : index
    %19 = vector.load %arg8[%c0_13, %c0_14] : memref<144x384xf32, #tpu.memory_space<vmem>>, vector<144x384xf32>
    %cst = arith.constant dense<0.000000e+00> : vector<16x384xf32>
    %20 = tpu.matmul %18, %19, %cst {dimension_numbers = #tpu.dot_dimension_numbers<[1], [0], [0], [1], [0, 0, 1, 1], [], []>} : vector<16x144xf32>, vector<144x384xf32>, vector<16x384xf32> -> vector<16x384xf32>
    %c0_15 = arith.constant 0 : index
    %c0_16 = arith.constant 0 : index
    %21 = vector.load %arg4[%c0_15, %c0_16] : memref<16x1xf32, #tpu.memory_space<vmem>>, vector<16x1xf32>
    %22 = vector.broadcast %21 : vector<16x1xf32> to vector<16x384xf32>
    %23 = arith.addf %20, %22 : vector<16x384xf32>
    %cst_17 = arith.constant 0.000000e+00 : f32
    %cst_18 = arith.constant 2.000000e+01 : f32
    %24 = vector.broadcast %cst_17 : f32 to vector<16x384xf32>
    %25 = arith.maximumf %24, %23 : vector<16x384xf32>
    %26 = vector.broadcast %cst_18 : f32 to vector<16x384xf32>
    %27 = arith.minimumf %26, %25 : vector<16x384xf32>
    %c0_19 = arith.constant 0 : index
    %c0_20 = arith.constant 0 : index
    %28 = vector.load %arg2[%c0_19, %c0_20] : memref<1x384xf32, #tpu.memory_space<vmem>>, vector<1x384xf32>
    %29 = vector.broadcast %28 : vector<1x384xf32> to vector<16x384xf32>
    %30 = arith.mulf %27, %29 : vector<16x384xf32>
    %c0_21 = arith.constant 0 : index
    %c0_22 = arith.constant 0 : index
    %31 = vector.load %arg9[%c0_21, %c0_22] : memref<16x384xf32, #tpu.memory_space<vmem>>, vector<16x384xf32>
    tpu.vector_store %arg9[%c0_21, %c0_22], %30 {strides = array<i32>} : memref<16x384xf32, #tpu.memory_space<vmem>>, vector<16x384xf32>,
    %c0_23 = arith.constant 0 : index
    %c0_24 = arith.constant 0 : index
    %32 = vector.load %arg9[%c0_23, %c0_24] : memref<16x384xf32, #tpu.memory_space<vmem>>, vector<16x384xf32>
    %c19_i32_25 = arith.constant 19 : i32
    %33 = tpu.dynamic_rotate %32 by %c19_i32_25 dim 1 : vector<16x384xf32>, i32 -> vector<16x384xf32>
    %c0_26 = arith.constant 0 : index
    %c0_27 = arith.constant 0 : index
    %34 = vector.load %arg8[%c0_26, %c0_27] : memref<144x384xf32, #tpu.memory_space<vmem>>, vector<16x384xf32>
    tpu.vector_store %arg8[%c0_26, %c0_27], %33 {strides = array<i32>} : memref<144x384xf32, #tpu.memory_space<vmem>>, vector<16x384xf32>,
    %c18_i32_28 = arith.constant 18 : i32
    %35 = tpu.dynamic_rotate %32 by %c18_i32_28 dim 1 : vector<16x384xf32>, i32 -> vector<16x384xf32>
    %c16_29 = arith.constant 16 : index
    %c0_30 = arith.constant 0 : index
    %36 = vector.load %arg8[%c16_29, %c0_30] : memref<144x384xf32, #tpu.memory_space<vmem>>, vector<16x384xf32>
    tpu.vector_store %arg8[%c16_29, %c0_30], %35 {strides = array<i32>} : memref<144x384xf32, #tpu.memory_space<vmem>>, vector<16x384xf32>,
    %c17_i32_31 = arith.constant 17 : i32
    %37 = tpu.dynamic_rotate %32 by %c17_i32_31 dim 1 : vector<16x384xf32>, i32 -> vector<16x384xf32>
    %c32_32 = arith.constant 32 : index
    %c0_33 = arith.constant 0 : index
    %38 = vector.load %arg8[%c32_32, %c0_33] : memref<144x384xf32, #tpu.memory_space<vmem>>, vector<16x384xf32>
    tpu.vector_store %arg8[%c32_32, %c0_33], %37 {strides = array<i32>} : memref<144x384xf32, #tpu.memory_space<vmem>>, vector<16x384xf32>,
    %c1_i32_34 = arith.constant 1 : i32
    %39 = tpu.dynamic_rotate %32 by %c1_i32_34 dim 1 : vector<16x384xf32>, i32 -> vector<16x384xf32>
    %c48_35 = arith.constant 48 : index
    %c0_36 = arith.constant 0 : index
    %40 = vector.load %arg8[%c48_35, %c0_36] : memref<144x384xf32, #tpu.memory_space<vmem>>, vector<16x384xf32>
    tpu.vector_store %arg8[%c48_35, %c0_36], %39 {strides = array<i32>} : memref<144x384xf32, #tpu.memory_space<vmem>>, vector<16x384xf32>,
    %c64_37 = arith.constant 64 : index
    %c0_38 = arith.constant 0 : index
    %41 = vector.load %arg8[%c64_37, %c0_38] : memref<144x384xf32, #tpu.memory_space<vmem>>, vector<16x384xf32>
    tpu.vector_store %arg8[%c64_37, %c0_38], %32 {strides = array<i32>} : memref<144x384xf32, #tpu.memory_space<vmem>>, vector<16x384xf32>,
    %c383_i32_39 = arith.constant 383 : i32
    %42 = tpu.dynamic_rotate %32 by %c383_i32_39 dim 1 : vector<16x384xf32>, i32 -> vector<16x384xf32>
    %c80_40 = arith.constant 80 : index
    %c0_41 = arith.constant 0 : index
    %43 = vector.load %arg8[%c80_40, %c0_41] : memref<144x384xf32, #tpu.memory_space<vmem>>, vector<16x384xf32>
    tpu.vector_store %arg8[%c80_40, %c0_41], %42 {strides = array<i32>} : memref<144x384xf32, #tpu.memory_space<vmem>>, vector<16x384xf32>,
    %c367_i32_42 = arith.constant 367 : i32
    %44 = tpu.dynamic_rotate %32 by %c367_i32_42 dim 1 : vector<16x384xf32>, i32 -> vector<16x384xf32>
    %c96_43 = arith.constant 96 : index
    %c0_44 = arith.constant 0 : index
    %45 = vector.load %arg8[%c96_43, %c0_44] : memref<144x384xf32, #tpu.memory_space<vmem>>, vector<16x384xf32>
    tpu.vector_store %arg8[%c96_43, %c0_44], %44 {strides = array<i32>} : memref<144x384xf32, #tpu.memory_space<vmem>>, vector<16x384xf32>,
    %c366_i32_45 = arith.constant 366 : i32
    %46 = tpu.dynamic_rotate %32 by %c366_i32_45 dim 1 : vector<16x384xf32>, i32 -> vector<16x384xf32>
    %c112_46 = arith.constant 112 : index
    %c0_47 = arith.constant 0 : index
    %47 = vector.load %arg8[%c112_46, %c0_47] : memref<144x384xf32, #tpu.memory_space<vmem>>, vector<16x384xf32>
    tpu.vector_store %arg8[%c112_46, %c0_47], %46 {strides = array<i32>} : memref<144x384xf32, #tpu.memory_space<vmem>>, vector<16x384xf32>,
    %c365_i32_48 = arith.constant 365 : i32
    %48 = tpu.dynamic_rotate %32 by %c365_i32_48 dim 1 : vector<16x384xf32>, i32 -> vector<16x384xf32>
    %c128_49 = arith.constant 128 : index
    %c0_50 = arith.constant 0 : index
    %49 = vector.load %arg8[%c128_49, %c0_50] : memref<144x384xf32, #tpu.memory_space<vmem>>, vector<16x384xf32>
    tpu.vector_store %arg8[%c128_49, %c0_50], %48 {strides = array<i32>} : memref<144x384xf32, #tpu.memory_space<vmem>>, vector<16x384xf32>,
    %c0_51 = arith.constant 0 : index
    %c0_52 = arith.constant 0 : index
    %50 = vector.load %arg5[%c0_51, %c0_52] : memref<16x144xf32, #tpu.memory_space<vmem>>, vector<16x144xf32>
    %c0_53 = arith.constant 0 : index
    %c0_54 = arith.constant 0 : index
    %51 = vector.load %arg8[%c0_53, %c0_54] : memref<144x384xf32, #tpu.memory_space<vmem>>, vector<144x384xf32>
    %cst_55 = arith.constant dense<0.000000e+00> : vector<16x384xf32>
    %52 = tpu.matmul %50, %51, %cst_55 {dimension_numbers = #tpu.dot_dimension_numbers<[1], [0], [0], [1], [0, 0, 1, 1], [], []>} : vector<16x144xf32>, vector<144x384xf32>, vector<16x384xf32> -> vector<16x384xf32>
    %c0_56 = arith.constant 0 : index
    %c0_57 = arith.constant 0 : index
    %53 = vector.load %arg6[%c0_56, %c0_57] : memref<16x1xf32, #tpu.memory_space<vmem>>, vector<16x1xf32>
    %54 = vector.broadcast %53 : vector<16x1xf32> to vector<16x384xf32>
    %55 = arith.addf %52, %54 : vector<16x384xf32>
    %56 = arith.addf %55, %0 : vector<16x384xf32>
    %cst_58 = arith.constant 0.000000e+00 : f32
    %cst_59 = arith.constant 2.000000e+01 : f32
    %57 = vector.broadcast %cst_58 : f32 to vector<16x384xf32>
    %58 = arith.maximumf %57, %56 : vector<16x384xf32>
    %59 = vector.broadcast %cst_59 : f32 to vector<16x384xf32>
    %60 = arith.minimumf %59, %58 : vector<16x384xf32>
    %c0_60 = arith.constant 0 : index
    %c0_61 = arith.constant 0 : index
    %61 = vector.load %arg7[%c0_60, %c0_61] : memref<16x384xf32, #tpu.memory_space<vmem>>, vector<16x384xf32>
    tpu.vector_store %arg7[%c0_60, %c0_61], %60 {strides = array<i32>} : memref<16x384xf32, #tpu.memory_space<vmem>>, vector<16x384xf32>,
    return
  }
  func.func @transform_0(%arg0: i32) -> (i32, i32) {
    %c0_i32 = arith.constant 0 : i32
    %c0_i32_0 = arith.constant 0 : i32
    return %c0_i32, %arg0 : i32, i32
  }
  func.func @transform_1(%arg0: i32) -> (i32, i32) {
    %c0_i32 = arith.constant 0 : i32
    %c0_i32_0 = arith.constant 0 : i32
    %c0_i32_1 = arith.constant 0 : i32
    return %c0_i32, %c0_i32_0 : i32, i32
  }
  func.func @transform_2(%arg0: i32) -> (i32, i32) {
    %c0_i32 = arith.constant 0 : i32
    %c0_i32_0 = arith.constant 0 : i32
    %c0_i32_1 = arith.constant 0 : i32
    return %c0_i32, %c0_i32_0 : i32, i32
  }
  func.func @transform_3(%arg0: i32) -> (i32, i32) {
    %c0_i32 = arith.constant 0 : i32
    %c0_i32_0 = arith.constant 0 : i32
    %c0_i32_1 = arith.constant 0 : i32
    return %c0_i32, %c0_i32_0 : i32, i32
  }
  func.func @transform_4(%arg0: i32) -> (i32, i32) {
    %c0_i32 = arith.constant 0 : i32
    %c0_i32_0 = arith.constant 0 : i32
    %c0_i32_1 = arith.constant 0 : i32
    return %c0_i32, %c0_i32_0 : i32, i32
  }
  func.func @transform_5(%arg0: i32) -> (i32, i32) {
    %c0_i32 = arith.constant 0 : i32
    %c0_i32_0 = arith.constant 0 : i32
    %c0_i32_1 = arith.constant 0 : i32
    return %c0_i32, %c0_i32_0 : i32, i32
  }
  func.func @transform_6(%arg0: i32) -> (i32, i32) {
    %c0_i32 = arith.constant 0 : i32
    %c0_i32_0 = arith.constant 0 : i32
    return %c0_i32, %arg0 : i32, i32
  }
}

</mosaic_0001>

<bundles_post_ra>
// kernel: tpu_custom_call.1
= control target key start
LH: loop header
LB: loop body
LE: loop exit
PB: predicated region body
PF: predicated region fallthrough
CT: control target
= control target key end

     0   :  { %s2673_s0 = inlined_call_operand.hbm [shape: f32[16,768], index: 0, kind: input, shape index: {}]   ;;  %s2674_s1 = inlined_call_operand.hbm [shape: f32[1,384], index: 1, kind: input, shape index: {}]   ;;  %s2675_s2 = inlined_call_operand.vmem [shape: f32[16,144], index: 2, kind: input, shape index: {}]   ;;  %s2676_s3 = inlined_call_operand.vmem [shape: f32[16,1], index: 3, kind: input, shape index: {}]   ;;  %s2677_s4 = inlined_call_operand.hbm [shape: f32[16,144], index: 4, kind: input, shape index: {}]   ;;  %s2678_s5 = inlined_call_operand.vmem [shape: f32[16,1], index: 5, kind: input, shape index: {}]   ;;  %s2679_s6 = inlined_call_operand.hbm [shape: f32[16,768], index: 6, kind: output, shape index: {}]  }
   0x1   :  { %2685 = sst [smem:[#allocation16_spill]] %s2674_s1 }
   0x2   :  { %2686 = sst [smem:[#allocation17_spill]] %s2677_s4 }
   0x3   :  { %11 = vsyncpa [#allocation5], 0 }
   0x4   :  { %13 = vsyncpa [#allocation5 + $0x1], 0 }
   0x5   :  { %14 = vsyncpa [#allocation8], 0 }
   0x6   :  { %15 = vsyncpa [#allocation6], 0 }
   0x7   :  { %17 = vsyncpa [#allocation6 + $0x1], 0  ;;  %s1892_s21 = smov 0   ;;  %s1894_s22 = smov 0  }
   0x8   :  { %s1896_s23 = smov 0   ;;  %s1898_s24 = smov 0  }
   0x9 LB: > { %s1913_s25 = sadd.s32 4294967295, %s1836_s24   ;;  %s1316_s26 = sadd.s32 4294967294, %s1836_s24   ;;  %s1836_s24 = sphi %s1898_s24, %s2701_s24   ;;  %s1832_s23 = sphi %s1896_s23, %s2705_s23   ;;  %s1828_s22 = sphi %s1894_s22, %s2704_s22   ;;  %s1824_s21 = sphi %s1892_s21, %s2703_s21  }
   0xa   : > { %s1917_s27 = sadd.s32 1, %s1836_s24   ;;  %s30_s28 = sadd.s32 1, %s1832_s23 }
   0xb   : > { %2687 = sst [smem:[#allocation14_spill]] %s1917_s27  ;;  %s27_s29 = ssub.s32 %s1836_s24, %s1917_s27 }
   0xc   : > { %p37_p0 = scmp.ne.s32.totalorder %s1832_s23, %s1828_s22  ;;  %p28_p1 = scmp.eq.s32.totalorder %s27_s29, 0 }
   0xd   : > { %p38_p2 = scmp.eq.s32.totalorder %s1836_s24, 0  ;;  %p43_p3 = scmp.ne.s32.totalorder %s1828_s22, %s1824_s21 }
   0xe   : > { %p44_p4 = scmp.eq.s32.totalorder %s1913_s25, 0  ;;  %p172_p7 = scmp.eq.s32.totalorder %s1913_s25, 1 }
   0xf   : > { %s1929_s30 = scalar_select %p28_p1, %s1832_s23, %s30_s28  }
  0x10   : > { %p1931_p5 = por %p38_p2, %p37_p0  ;;  %p1937_p6 = por %p44_p4, %p43_p3 }
  0x11   : > { %2688 = sst [smem:[#allocation15_spill]] %s1929_s30  ;;  %p178_p8 = scmp.eq.s32.totalorder %s1316_s26, 1 }
  0x12   : > { %p1317_p9 = scmp.ge.s32.totalorder %s1836_s24, 1  ;;  %p185_p10 = scmp.lt.s32.totalorder %s1836_s24, 3 }
  0x13   : > { %p1944_p11 = por %p172_p7, %p37_p0  ;;  %p1948_p12 = por %p178_p8, %p43_p3 }
  0x14   : > { %p1952_p13 = pnand %p1317_p9, %p185_p10  ;;  %s2694_s1 = sld [smem:[#allocation16_spill]] }
  0x15   : > { %s1838_s15 = smov [#allocation7]   ;;  %p1373_p3 = scmp.lt.s32.totalorder %s1836_s24, 2 }
  0x16   : > { %p1356_p1 = pneg %p1952_p13  ;;  %s199_s16 = sshll.u32 %s1838_s15, 4  ;;  %s200_s16 = int_to_ptr.vmem [resolvable:$true] %s199_s16 }
  0x17   : > { %s2695_s4 = sld [smem:[#allocation17_spill]]  ;;  %p1970_p7 = pnand %p1373_p3, %p1931_p5 }
  0x18   : > { %p1357_p2 = pnand %p1356_p1, %p44_p4  ;;  %s1839_s26 = smov [#allocation9]  }
  0x19   : > { %s216_s28 = sshll.u32 %s1839_s26, 4  ;;  %s233_s29 = sand.u32 1, %s1832_s23   ;;  %s217_s28 = int_to_ptr.vmem [resolvable:$true] %s216_s28 }
  0x1a   : > { %s197_s14 = sshll.u32 %s2694_s1, 4  ;;  %s1840_s12 = smov 256   ;;  %s198_s14 = int_to_ptr.hbm [resolvable:$true] %s197_s14 }
  0x1b   : > { %1359 = dma.hbm_to_vmem [thread:$0]  (!%p1357_p2), %s198_s14, 48, %s200_s16, [#allocation8]  }
  0x1c   : > { %s1841_s13 = smov 16   ;;  %s1342_s15 = smul.u32 48, %s233_s29 }
  0x1d   : > { %s214_s19 = sshll.u32 %s2695_s4, 4  ;;  %s1340_s1 = smul.u32 24, %s1836_s24  ;;  %s215_s19 = int_to_ptr.hbm [resolvable:$true] %s214_s19 }
  0x1e   : > { %1362 = dma.hbm_to_vmem [thread:$0]  (!%p1357_p2), %s215_s19, 512, %s217_s28, [#allocation8], %s1840_s12, %s1840_s12, %s1841_s13  }
  0x1f   : > { %s242_s18 = scalar_lea.hbm %s2673_s0, %s1340_s1  ;;  %s237_s14 = scalar_lea.vmem [#allocation4], %s1342_s15 }
  0x20   : > { %s245_s7 = sshll.u32 %s237_s14, 4  ;;  %s243_s16 = sshll.u32 %s242_s18, 4  ;;  %s246_s7 = int_to_ptr.vmem [resolvable:$true] %s245_s7  ;;  %s244_s16 = int_to_ptr.hbm [resolvable:$true] %s243_s16 }
  0x21   : > { %s234_s4 = scalar_lea.sflag [#allocation5], %s233_s29  ;;  %s1736_s27 = sshra.s32 %s244_s16, 4  ;;  %s1737_s27 = int_to_ptr.hbm [resolvable:$true] %s1736_s27 }
  0x22   : > { %s1738_s26 = scalar_lea.hbm %s1737_s27, 48  ;;  %p1740_p8 = pneg %p1970_p7 }
  0x23   : > { %p1739_p5 = scmp.ne.s32.totalorder %s1737_s27, %s1738_s26  ;;  %s1743_s12 = scalar_lea.hbm %s2673_s0, 96 }
  0x24   : > { %p1744_p1 = scmp.lt.s32.totalorder %s1737_s27, %s2673_s0  ;;  %p1745_p2 = scmp.lt.s32.totalorder %s1743_s12, %s1738_s26 }
  0x25   : > { %p1741_p9 = pnand %p1740_p8, %p1739_p5 }
  0x26   : > { %p1746_p3 = por %p1745_p2, %p1744_p1 }
  0x27   : > { %p1742_p10 = pneg %p1741_p9 }
  0x29   : > { %p1747_p0 = pnand %p1746_p3, %p1742_p10 }
  0x2b   : > { %1750 = shalt.err (!%p1747_p0)
}
  0x2c   : > { %s1842_s29 = smov 768   ;;  %s1843_s13 = smov 384  }
  0x2d   : > { %s1844_s15 = smov 24   ;;  %257 = sbr.rel (%p1952_p13) target bundleno = 737 (0x2e1), region = 44 }
  0x2e   : > { %1366 = dma.hbm_to_vmem [thread:$0]  (!%p1970_p7), %s244_s16, 768, %s246_s7, %s234_s4, %s1842_s29, %s1843_s13, %s1844_s15  }
  0x2f   : > { %s1992_s17 = sand.u32 (!%p1952_p13), 1, %s1828_s22  }
  0x30   : > { %s1343_s27 = smul.u32 (!%p1952_p13), 48, %s1992_s17  ;;  %s260_s18 = scalar_lea.sflag (!%p1952_p13), [#allocation5], %s1992_s17 }
  0x32   : > { %s1998_s14 = scalar_lea.vmem [#allocation4], %s1343_s27 }
  0x33   : > { %1811 = dma.done.wait (%p1937_p6), %s260_s18, 768  }
  0x34   : > { %1813 = vsyncadd (%p1937_p6), %s260_s18, 4294966528 }
  0x35   : > { %1815 = dma.done.wait (%p44_p4), [#allocation8], 560  }
  0x36   : > { %1817 = vsyncadd (%p44_p4), [#allocation8], 4294966736  ;;  %v2009_v0 = vld [vmem:[%s1998_s14 + $0x20] sm:$0xff]  ;;  %v2012_v1 = vld [vmem:[%s1998_s14 + $0x28] sm:$0xff]  ;;  %s1845_s4 = smov 111   ;;  %s1846_s8 = smov 110   ;;  %v323_v14 = vlaneseq }
  0x37   : > { %v1438_v2 = vpack.i.bf16 %v2012_v1, %v2009_v0  ;;  %v2017_v3 = vld [vmem:[%s1998_s14] sm:$0xff]  ;;  %v2020_v4 = vld [vmem:[%s1998_s14 + $0x18] sm:$0xff]  ;;  %v2027_v6 = vld [vmem:[%s1998_s14 + $0x8] sm:$0xff]  ;;  %s1847_s11 = smov 127   ;;  %s1848_s20 = smov 1   ;;  %vm589_vm8 = vcmask 130048  }
  0x38   : > { %v1448_v5 = vpack.i.bf16 %v2017_v3, %v2020_v4  ;;  %v2030_v7 = vld [vmem:[%s1998_s14 + $0x10] sm:$0xff]  ;;  %v1473_v9 = vpack.i.bf16 %v2009_v0, %v2020_v4  ;;  %v1478_v10 = vpack.i.bf16 %v2027_v6, %v2017_v3  ;;  %s1849_s7 = smov 17   ;;  %s1850_s16 = smov 18   ;;  %v2068_v16 = vand.u32 127, %v323_v14 }
  0x39   : > { %1439 = vrot.lane.b32.xlu1 %v1438_v2, %s1845_s4  ;;  %1429 = vrot.lane.b32.xlu0 %v1438_v2, %s1846_s8  ;;  %v1443_v8 = vpack.i.bf16 %v2030_v7, %v2027_v6  ;;  %v1493_v11 = vpack.i.bf16 %v2030_v7, %v2012_v1  ;;  %s1851_s26 = smov 19   ;;  %s1852_s19 = smov 109  }
  0x3a   : > { %1449 = vrot.lane.b32.xlu2 %v1448_v5, %s1846_s8  ;;  %vm481_vm0 = vcmp.lt.s32.totalorder %v2068_v16, 110  ;;  %vm456_vm1 = vcmp.lt.s32.totalorder %v2068_v16, 111  ;;  %vm431_vm2 = vcmp.lt.s32.totalorder %v2068_v16, 127  ;;  %vm400_vm3 = vcmp.lt.s32.totalorder %v2068_v16, 1  ;;  %s1209_s13 = scalar_lea.sflag [#allocation6], %s1992_s17  ;;  %s1786_s12 = scalar_lea.hbm %s2679_s6, 96 }
  0x3b   : > { %vm375_vm4 = vcmp.lt.s32.totalorder %v2068_v16, 17  ;;  %vm350_vm5 = vcmp.lt.s32.totalorder %v2068_v16, 18  ;;  %vm325_vm6 = vcmp.lt.s32.totalorder %v2068_v16, 19  ;;  %vm506_vm7 = vcmp.lt.s32.totalorder %v2068_v16, 109 }
  0x41   : > { %1444 = vrot.lane.b32.xlu1 %v1443_v8, %s1845_s4  ;;  %1434 = vrot.lane.b32.xlu0 %v1443_v8, %s1846_s8 }
  0x42   : > { %1454 = vrot.lane.b32.xlu2 %v1438_v2, %s1847_s11 }
  0x49   : > { %1459 = vrot.lane.b32.xlu0 %v1443_v8, %s1847_s11  ;;  %1464 = vrot.lane.b32.xlu1 %v1448_v5, %s1845_s4 }
  0x4a   : > { %1469 = vrot.lane.b32.xlu2 %v1448_v5, %s1847_s11 }
  0x51   : > { %1474 = vrot.lane.b32.xlu0 %v1473_v9, %s1848_s20  ;;  %1479 = vrot.lane.b32.xlu1 %v1478_v10, %s1848_s20 }
  0x52   : > { %1484 = vrot.lane.b32.xlu2 %v1473_v9, %s1849_s7 }
  0x59   : > { %1489 = vrot.lane.b32.xlu0 %v1478_v10, %s1849_s7  ;;  %1494 = vrot.lane.b32.xlu1 %v1493_v11, %s1848_s20 }
  0x5a   : > { %1499 = vrot.lane.b32.xlu2 %v1473_v9, %s1850_s16 }
  0x61   : > { %1504 = vrot.lane.b32.xlu0 %v1478_v10, %s1850_s16  ;;  %1509 = vrot.lane.b32.xlu1 %v1493_v11, %s1849_s7 }
  0x62   : > { %1514 = vrot.lane.b32.xlu2 %v1473_v9, %s1851_s26 }
  0x69   : > { %1519 = vrot.lane.b32.xlu0 %v1438_v2, %s1852_s19  ;;  %1524 = vrot.lane.b32.xlu1 %v1478_v10, %s1851_s26 }
  0x6a   : > { %1529 = vrot.lane.b32.xlu2 %v1493_v11, %s1850_s16 }
  0x71   : > { %1534 = vrot.lane.b32.xlu0 %v1443_v8, %s1852_s19  ;;  %1539 = vrot.lane.b32.xlu1 %v1448_v5, %s1852_s19 }
  0x72   : > { %1544 = vrot.lane.b32.xlu2 %v1493_v11, %s1851_s26 }
  0x94   : > { %v2062_v12 = vpop.permute.xlu2 %1449 }
  0x95   : > { %v1451_v17 = vunpack.i.l.bf16 %v2062_v12  ;;  %v1452_v25 = vunpack.i.h.bf16 %v2062_v12  ;;  %v522_v12 = vld [vmem:[%s2675_s2 + $0x18] sm:$0xff] }
  0x9c   : > { %v2064_v13 = vpop.permute.xlu2 %1454 }
  0x9d   : > { %v1457_v32 = vunpack.i.h.bf16 %v2064_v13  ;;  %v1456_v33 = vunpack.i.l.bf16 %v2064_v13 }
  0x9f   : > { %v433_v41 = vsel %vm431_vm2, %v1456_v33, %v1457_v32 }
  0xa4   : > { %v2066_v15 = vpop.permute.xlu2 %1469 }
  0xa5   : > { %v1471_v42 = vunpack.i.l.bf16 %v2066_v15  ;;  %v1472_v51 = vunpack.i.h.bf16 %v2066_v15 }
  0xa7   : > { %v435_v53 = vsel %vm431_vm2, %v1471_v42, %v1456_v33 }
  0xab   : > { %v2071_v18 = vpop.permute.xlu1 %1439  ;;  %v2073_v19 = vpop.permute.xlu0 %1429 }
  0xac   : > { %v1432_v20 = vunpack.i.h.bf16 %v2073_v19  ;;  %v1431_v21 = vunpack.i.l.bf16 %v2073_v19  ;;  %v2078_v22 = vpop.permute.xlu2 %1484  ;;  %v1442_v28 = vunpack.i.h.bf16 %v2071_v18  ;;  %v1441_v29 = vunpack.i.l.bf16 %v2071_v18 }
  0xad   : > { %v1487_v55 = vunpack.i.h.bf16 %v2078_v22  ;;  %v1486_v56 = vunpack.i.l.bf16 %v2078_v22  ;;  %v437_v18 = vsel %vm431_vm2, %v1457_v32, %v1471_v42 }
  0xae   : > { %v485_v23 = vsel %vm481_vm0, %v1451_v17, %v1431_v21  ;;  %v483_v24 = vsel %vm481_vm0, %v1431_v21, %v1432_v20  ;;  %v458_v39 = vsel %vm456_vm1, %v1441_v29, %v1442_v28 }
  0xaf   : > { %596 = vmatpush.msra.mxu0 %v485_v23  ;;  %642 = vmatpush.msra.mxu2 %v483_v24  ;;  %v379_v5 = vsel %vm375_vm4, %v1486_v56, %v1487_v55 }
  0xb3   : > { %v2089_v26 = vpop.permute.xlu1 %1444  ;;  %v2091_v27 = vpop.permute.xlu0 %1434 }
  0xb4   : > { %v1437_v30 = vunpack.i.h.bf16 %v2091_v27  ;;  %v1436_v31 = vunpack.i.l.bf16 %v2091_v27  ;;  %v1447_v34 = vunpack.i.h.bf16 %v2089_v26  ;;  %v1446_v35 = vunpack.i.l.bf16 %v2089_v26  ;;  %v2110_v38 = vpop.permute.xlu2 %1499 }
  0xb5   : > { %v1501_v8 = vunpack.i.l.bf16 %v2110_v38 }
  0xb6   : > { %v482_v36 = vsel %vm481_vm0, %v1436_v31, %v1437_v30  ;;  %v484_v37 = vsel %vm481_vm0, %v1452_v25, %v1436_v31  ;;  %v457_v40 = vsel %vm456_vm1, %v1446_v35, %v1447_v34 }
  0xb7   : > { %643 = vmatpush.msra.mxu2 %v482_v36  ;;  %597 = vmatpush.msra.mxu0 %v484_v37 }
  0xb9   : > { %644 = vmatpush.msra.mxu2 %v458_v39 }
  0xbb   : > { %v2126_v43 = vpop.permute.xlu0 %1459  ;;  %645 = vmatpush.msra.mxu2 %v457_v40  ;;  %v2128_v44 = vpop.permute.xlu1 %1464 }
  0xbc   : > { %v1462_v45 = vunpack.i.h.bf16 %v2126_v43  ;;  %v1461_v46 = vunpack.i.l.bf16 %v2126_v43  ;;  %v1467_v47 = vunpack.i.h.bf16 %v2128_v44  ;;  %v1466_v48 = vunpack.i.l.bf16 %v2128_v44  ;;  %v2151_v54 = vpop.permute.xlu2 %1514 }
  0xbd   : > { %646 = vmatpush.msra.mxu2 %v433_v41  ;;  %v2684_v33 = vunpack.i.h.bf16 %v2151_v54  ;;  %v2697_v26 = vunpack.i.h.bf16 %v2151_v54 }
  0xbe   : > { %v460_v49 = vsel %vm456_vm1, %v1466_v48, %v1441_v29  ;;  %v432_v50 = vsel %vm431_vm2, %v1461_v46, %v1462_v45  ;;  %v459_v52 = vsel %vm456_vm1, %v1467_v47, %v1446_v35  ;;  %v434_v59 = vsel %vm431_vm2, %v1472_v51, %v1461_v46 }
  0xbf   : > { %598 = vmatpush.msra.mxu0 %v460_v49  ;;  %647 = vmatpush.msra.mxu2 %v432_v50  ;;  %v1516_v35 = vunpack.i.l.bf16 %v2151_v54  ;;  %v461_v19 = vsel %vm456_vm1, %v1447_v34, %v1467_v47 }
  0xc1   : > { %599 = vmatpush.msra.mxu0 %v459_v52  ;;  %648 = vmatpush.msra.mxu2 %v2009_v0 }
  0xc3   : > { %v2156_v57 = vpop.permute.xlu0 %1474  ;;  %v2158_v58 = vpop.permute.xlu1 %1479  ;;  %600 = vmatpush.msra.mxu0 %v435_v53  ;;  %649 = vmatpush.msra.mxu2 %v2027_v6  ;;  %v1502_v6 = vunpack.i.h.bf16 %v2110_v38 }
  0xc4   : > { %v1477_v60 = vunpack.i.h.bf16 %v2156_v57  ;;  %v1476_v61 = vunpack.i.l.bf16 %v2156_v57  ;;  %v1482_v62 = vunpack.i.h.bf16 %v2158_v58  ;;  %v1481_v63 = vunpack.i.l.bf16 %v2158_v58  ;;  %v2187_v9 = vpop.permute.xlu2 %1529 }
  0xc5   : > { %601 = vmatpush.msra.mxu0 %v434_v59  ;;  %v354_v29 = vsel %vm350_vm5, %v1501_v8, %v1502_v6  ;;  %v1531_v39 = vunpack.i.l.bf16 %v2187_v9  ;;  %v329_v59 = vsel %vm325_vm6, %v1516_v35, %v2684_v33 }
  0xc6   : > { %v404_v0 = vsel %vm400_vm3, %v1476_v61, %v1477_v60  ;;  %v403_v2 = vsel %vm400_vm3, %v1481_v63, %v1482_v62 }
  0xc7   : > { %650 = vmatpush.msra.mxu2 %v404_v0  ;;  %602 = vmatpush.msra.mxu0 %v2020_v4  ;;  %v356_v0 = vsel %vm350_vm5, %v1531_v39, %v1501_v8 }
  0xc9   : > { %651 = vmatpush.msra.mxu2 %v403_v2  ;;  %603 = vmatpush.msra.mxu0 %v2017_v3 }
  0xcb   : > { %v2189_v4 = vpop.permute.xlu0 %1489  ;;  %v2191_v10 = vpop.permute.xlu1 %1494  ;;  %652 = vmatpush.msra.mxu2 %v379_v5 }
  0xcc   : > { %v1492_v11 = vunpack.i.h.bf16 %v2189_v4  ;;  %v1491_v14 = vunpack.i.l.bf16 %v2189_v4  ;;  %v1497_v21 = vunpack.i.h.bf16 %v2191_v10  ;;  %v1496_v3 = vunpack.i.l.bf16 %v2191_v10  ;;  %v2226_v50 = vpop.permute.xlu2 %1544 }
  0xce   : > { %v406_v23 = vsel %vm400_vm3, %v1496_v3, %v1476_v61  ;;  %v378_v24 = vsel %vm375_vm4, %v1491_v14, %v1492_v11  ;;  %v405_v31 = vsel %vm400_vm3, %v1497_v21, %v1481_v63  ;;  %v1532_v61 = vunpack.i.h.bf16 %v2187_v9 }
  0xcf   : > { %604 = vmatpush.msra.mxu0 %v406_v23  ;;  %653 = vmatpush.msra.mxu2 %v378_v24  ;;  %v1546_v63 = vunpack.i.l.bf16 %v2226_v50  ;;  %v2683_v23 = vunpack.i.h.bf16 %v2226_v50  ;;  %v402_v13 = vsel %vm400_vm3, %v1477_v60, %v1496_v3  ;;  %v401_v15 = vsel %vm400_vm3, %v1482_v62, %v1497_v21 }
  0xd1   : > { %605 = vmatpush.msra.mxu0 %v405_v31  ;;  %654 = vmatpush.msra.mxu2 %v354_v29  ;;  %v327_v27 = vsel %vm325_vm6, %v2697_v26, %v1546_v63 }
  0xd3   : > { %v2216_v36 = vpop.permute.xlu0 %1504  ;;  %v2218_v37 = vpop.permute.xlu1 %1509 }
  0xd4   : > { %v1507_v40 = vunpack.i.h.bf16 %v2216_v36  ;;  %v1506_v41 = vunpack.i.l.bf16 %v2216_v36  ;;  %v1512_v46 = vunpack.i.h.bf16 %v2218_v37  ;;  %v1511_v49 = vunpack.i.l.bf16 %v2218_v37 }
  0xd6   : > { %v381_v52 = vsel %vm375_vm4, %v1511_v49, %v1486_v56  ;;  %v353_v53 = vsel %vm350_vm5, %v1506_v41, %v1507_v40  ;;  %v380_v56 = vsel %vm375_vm4, %v1512_v46, %v1491_v14  ;;  %v355_v24 = vsel %vm350_vm5, %v1532_v61, %v1506_v41 }
  0xd7   : > { %606 = vmatpush.msra.mxu0 %v381_v52  ;;  %655 = vmatpush.msra.mxu2 %v353_v53  ;;  %v331_v14 = vsel %vm325_vm6, %v1546_v63, %v1516_v35  ;;  %v2267_v53 = vld [vmem:[%s2675_s2] sm:$0xff]  ;;  %v351_v22 = vsel %vm350_vm5, %v1507_v40, %v1532_v61 }
  0xd9   : > { %607 = vmatpush.msra.mxu0 %v380_v56  ;;  %656 = vmatpush.msra.mxu2 %v329_v59  ;;  %v578_v56 = vld [vmem:[%s2676_s3 + $0x8] sm:$0xff] }
  0xdb   : > { %v1520_v2 = vpop.permute.xlu0 %1519  ;;  %v2250_v5 = vpop.permute.xlu1 %1524  ;;  %608 = vmatpush.msra.mxu0 %v356_v0  ;;  %v577_v0 = vld [vmem:[%s2676_s3] sm:$0xff] }
  0xdc   : > { %v1522_v8 = vunpack.i.h.bf16 %v1520_v2  ;;  %v1521_v29 = vunpack.i.l.bf16 %v1520_v2  ;;  %v2682_v31 = vunpack.i.h.bf16 %v2250_v5  ;;  %v1526_v52 = vunpack.i.l.bf16 %v2250_v5 }
  0xdd   : > { %609 = vmatpush.msra.mxu0 %v355_v24  ;;  %v1853_v2 = vmov 0  }
  0xde   : > { %v328_v41 = vsel %vm325_vm6, %v1526_v52, %v2682_v31  ;;  %v508_v35 = vsel %vm506_vm7, %v1521_v29, %v1522_v8  ;;  %v330_v59 = vsel %vm325_vm6, %v2683_v23, %v1526_v52  ;;  %1549 = vset.pattern.permute.xlu1 %v1853_v2  ;;  %1548 = vset.pattern.permute.xlu0 %v1853_v2  ;;  %v521_v23 = vld [vmem:[%s2675_s2 + $0x10] sm:$0xff] }
  0xdf   : > { %610 = vmatpush.msra.mxu0 %v331_v14  ;;  %657 = vmatpush.msra.mxu2 %v328_v41 }
  0xe0   : > { %679 = vmatpush.msra.mxu3 %v508_v35  ;;  %658 = vmatmul.f32.vlgmr.msra.gmra.mxu2 %v2267_v53 }
  0xe1   : > { %611 = vmatpush.msra.mxu0 %v330_v59  ;;  %586 = vperm.xlu0 %1548, %v578_v56   ;;  %v520_v56 = vld [vmem:[%s2675_s2 + $0x8] sm:$0xff] }
  0xe2   : > { %612 = vmatmul.f32.vlgmr.msra.gmra.mxu0 %v2267_v53  ;;  %581 = vperm.xlu1 %1549, %v577_v0  }
  0xe3   : > { %v1535_v24 = vpop.permute.xlu0 %1534  ;;  %v1540_v14 = vpop.permute.xlu1 %1539 }
  0xe4   : > { %v1537_v52 = vunpack.i.h.bf16 %v1535_v24  ;;  %v1536_v41 = vunpack.i.l.bf16 %v1535_v24  ;;  %v1542_v35 = vunpack.i.h.bf16 %v1540_v14  ;;  %v1541_v31 = vunpack.i.l.bf16 %v1540_v14 }
  0xe6   : > { %v510_v59 = vsel %vm506_vm7, %v1541_v31, %v1521_v29  ;;  %v507_v33 = vsel %vm506_vm7, %v1536_v41, %v1537_v52  ;;  %v512_v2 = vsel %vm506_vm7, %v1522_v8, %v1541_v31  ;;  %v509_v0 = vsel %vm506_vm7, %v1542_v35, %v1536_v41 }
  0xe7   : > { %633 = vmatpush.msra.mxu1 %v510_v59  ;;  %680 = vmatpush.msra.mxu3 %v507_v33  ;;  %v487_v8 = vsel %vm481_vm0, %v1432_v20, %v1451_v17  ;;  %v511_v29 = vsel %vm506_vm7, %v1537_v52, %v1542_v35  ;;  %v486_v33 = vsel %vm481_vm0, %v1437_v30, %v1452_v25  ;;  %v2699_v30 = vunpack.i.h.bf16 %v2250_v5 }
  0xe8   : > { %661 = vmatmul.f32.gmra.mxu2 %v521_v23  ;;  %1327 = vmatmul.msk.f32.vlgmr.msra.gmra.mxu3 %vm589_vm8, %v520_v56  ;;  %v462_v17 = vsel %vm456_vm1, %v1442_v28, %v1466_v48  ;;  %v436_v20 = vsel %vm431_vm2, %v1462_v45, %v1472_v51  ;;  %v352_v25 = vsel %vm350_vm5, %v1502_v6, %v1531_v39  ;;  %v2698_v28 = vunpack.i.h.bf16 %v2226_v50  ;;  %v746_v48 = vld [vmem:[#allocation7] sm:$0x7] }
  0xe9   : > { %725 = vmatpush.msrb.mxu3 %v512_v2  ;;  %634 = vmatpush.msra.mxu1 %v509_v0  ;;  %v748_v58 = vperm.slane %v746_v48, 0  ;;  %v749_v62 = vperm.slane %v746_v48, 1  ;;  %v750_v63 = vperm.slane %v746_v48, 2 }
  0xea   : > { %1325 = vmatmul.msk.f32.vlgmr.msra.gmra.mxu1 %vm589_vm8, %v520_v56  ;;  %615 = vmatmul.f32.gmra.mxu0 %v521_v23  ;;  %v326_v32 = vsel %vm325_vm6, %v2699_v30, %v2698_v28 }
  0xeb   : > { %688 = vmatpush.msrb.mxu1 %v487_v8  ;;  %726 = vmatpush.msrb.mxu3 %v511_v29 }
  0xed   : > { %689 = vmatpush.msrb.mxu1 %v486_v33 }
  0xef   : > { %690 = vmatpush.msrb.mxu1 %v462_v17 }
  0xf0   : > { %1328 = vmatmul.msk.f32.gmra.mxu3 %vm589_vm8, %v522_v12 }
  0xf1   : > { %691 = vmatpush.msrb.mxu1 %v461_v19 }
  0xf2   : > { %1326 = vmatmul.msk.f32.gmra.mxu1 %vm589_vm8, %v522_v12 }
  0xf3   : > { %692 = vmatpush.msrb.mxu1 %v437_v18 }
  0xf5   : > { %693 = vmatpush.msrb.mxu1 %v436_v20 }
  0xf7   : > { %694 = vmatpush.msrb.mxu1 %v2012_v1  ;;  %v377_v1 = vsel %vm375_vm4, %v1487_v55, %v1511_v49 }
  0xf8   : > { %1329 = vmatmul.msk.f32.vlgmr.msrb.gmra.mxu3 %vm589_vm8, %v520_v56 }
  0xf9   : > { %695 = vmatpush.msrb.mxu1 %v2030_v7  ;;  %v376_v7 = vsel %vm375_vm4, %v1492_v11, %v1512_v46 }
  0xfb   : > { %696 = vmatpush.msrb.mxu1 %v402_v13 }
  0xfd   : > { %697 = vmatpush.msrb.mxu1 %v401_v15 }
  0xff   : > { %698 = vmatpush.msrb.mxu1 %v377_v1 }
 0x100   : > { %1330 = vmatmul.msk.f32.gmra.mxu3 %vm589_vm8, %v522_v12 }
 0x101   : > { %699 = vmatpush.msrb.mxu1 %v376_v7  ;;  %v1028_v7 = vld [vmem:[%s2678_s5] sm:$0xff] }
 0x103   : > { %700 = vmatpush.msrb.mxu1 %v352_v25 }
 0x105   : > { %701 = vmatpush.msrb.mxu1 %v351_v22  ;;  %v1029_v22 = vld [vmem:[%s2678_s5 + $0x8] sm:$0xff] }
 0x107   : > { %702 = vmatpush.msrb.mxu1 %v327_v27 }
 0x109   : > { %703 = vmatpush.msrb.mxu1 %v326_v32 }
 0x10a   : > { %704 = vmatmul.f32.vlgmr.msrb.gmra.mxu1 %v2267_v53 }
 0x112   : > { %707 = vmatmul.f32.gmra.mxu1 %v521_v23 }
 0x153   : > { %v587_v3 = vpop.permute.xlu0 %586 }
 0x154   : > { %v582_v34 = vpop.permute.xlu1 %581 }
 0x15f   : > { %v613_v38 = vpop.f32.mrf.mxu0 }
 0x160   : > { %v614_v42 = vadd.f32 %v613_v38, %v582_v34 }
 0x163   : > { %v659_v44 = vpop.f32.mrf.mxu2 }
 0x164   : > { %v660_v47 = vadd.f32 %v659_v44, %v582_v34 }
 0x167   : > { %v636_v43 = vpop.f32.mrf.mxu1  ;;  %v616_v36 = vpop.f32.mrf.mxu0 }
 0x168   : > { %v637_v45 = vadd.f32 %v636_v43, %v614_v42  ;;  %v617_v40 = vadd.f32 %v616_v36, %v587_v3 }
 0x16a   : > { %v734_v51 = vmax.f32 %v637_v45, 0.0 }
 0x16b   : > { %v682_v54 = vpop.f32.mrf.mxu3  ;;  %v662_v5 = vpop.f32.mrf.mxu2 }
 0x16c   : > { %v683_v55 = vadd.f32 %v682_v54, %v660_v47  ;;  %v740_v57 = vmin.f32 %v734_v51, 20.0  ;;  %v663_v14 = vadd.f32 %v662_v5, %v587_v3 }
 0x16e   : > { %v735_v60 = vmax.f32 %v683_v55, 0.0  ;;  %v2399_v9 = vmul.f32 %v748_v58, %v740_v57 }
 0x16f   : > { %v639_v21 = vpop.f32.mrf.mxu1 }
 0x170   : > { %v741_v6 = vmin.f32 %v735_v60, 20.0  ;;  %v640_v50 = vadd.f32 %v639_v21, %v617_v40 }
 0x172   : > { %v2401_v4 = vmul.f32 %v749_v62, %v741_v6  ;;  %v737_v24 = vmax.f32 %v640_v50, 0.0 }
 0x173   : > { %v685_v11 = vpop.f32.mrf.mxu3 }
 0x174   : > { %v1560_v10 = vpack.i.bf16 %v2401_v4, %v2399_v9  ;;  %v743_v2 = vmin.f32 %v737_v24, 20.0  ;;  %v686_v56 = vadd.f32 %v685_v11, %v663_v14 }
 0x176   : > { %1561 = vrot.lane.b32.xlu0 %v1560_v10, %s1845_s4  ;;  %1556 = vrot.lane.b32.xlu1 %v1560_v10, %s1846_s8  ;;  %v2412_v29 = vmul.f32 %v748_v58, %v743_v2  ;;  %v738_v33 = vmax.f32 %v686_v56, 0.0 }
 0x178   : > { %v744_v18 = vmin.f32 %v738_v33, 20.0  ;;  %v1665_v26 = vpack.i.bf16 %v2399_v9, %v2412_v29 }
 0x17a   : > { %v2423_v20 = vmul.f32 %v749_v62, %v744_v18 }
 0x17b   : > { %v728_v37 = vpop.f32.mrf.mxu3 }
 0x17c   : > { %v1595_v13 = vpack.i.bf16 %v2423_v20, %v2412_v29  ;;  %v1645_v15 = vpack.i.bf16 %v2401_v4, %v2423_v20 }
 0x183   : > { %v731_v53 = vpop.f32.mrf.mxu3 }
 0x187   : > { %v705_v39 = vpop.f32.mrf.mxu1 }
 0x188   : > { %v706_v46 = vadd.f32 %v705_v39, %v582_v34 }
 0x18a   : > { %v729_v49 = vadd.f32 %v728_v37, %v706_v46 }
 0x18c   : > { %v736_v61 = vmax.f32 %v729_v49, 0.0 }
 0x18e   : > { %v742_v23 = vmin.f32 %v736_v61, 20.0 }
 0x18f   : > { %v708_v31 = vpop.f32.mrf.mxu1 }
 0x190   : > { %v2407_v52 = vmul.f32 %v750_v63, %v742_v23  ;;  %v709_v41 = vadd.f32 %v708_v31, %v587_v3 }
 0x192   : > { %v732_v35 = vadd.f32 %v731_v53, %v709_v41  ;;  %v1550_v59 = vpack.i.bf16 %v2407_v52, %v2399_v9  ;;  %v1640_v25 = vpack.i.bf16 %v2407_v52, %v2401_v4 }
 0x194   : > { %v739_v0 = vmax.f32 %v732_v35, 0.0  ;;  %1551 = vrot.lane.b32.xlu2 %v1550_v59, %s1848_s20 }
 0x196   : > { %v745_v8 = vmin.f32 %v739_v0, 20.0 }
 0x198   : > { %v2414_v17 = vmul.f32 %v750_v63, %v745_v8 }
 0x19a   : > { %v1570_v12 = vpack.i.bf16 %v2407_v52, %v2414_v17  ;;  %v1575_v19 = vpack.i.bf16 %v2414_v17, %v2412_v29  ;;  %v1650_v1 = vpack.i.bf16 %v2414_v17, %v2423_v20 }
 0x19c   : > { %1571 = vrot.lane.b32.xlu0 %v1570_v12, %s1846_s8  ;;  %1576 = vrot.lane.b32.xlu1 %v1575_v19, %s1848_s20 }
 0x19d   : > { %1566 = vrot.lane.b32.xlu2 %v1560_v10, %s1847_s11 }
 0x1a4   : > { %1581 = vrot.lane.b32.xlu0 %v1570_v12, %s1845_s4  ;;  %1596 = vrot.lane.b32.xlu1 %v1595_v13, %s1847_s11 }
 0x1a5   : > { %1586 = vrot.lane.b32.xlu2 %v1595_v13, %s1846_s8 }
 0x1ac   : > { %1611 = vrot.lane.b32.xlu0 %v1570_v12, %s1847_s11  ;;  %1601 = vrot.lane.b32.xlu1 %v1575_v19, %s1849_s7 }
 0x1ad   : > { %1591 = vrot.lane.b32.xlu2 %v1595_v13, %s1845_s4 }
 0x1b4   : > { %1626 = vrot.lane.b32.xlu0 %v1575_v19, %s1851_s26  ;;  %1616 = vrot.lane.b32.xlu1 %v1575_v19, %s1850_s16 }
 0x1b5   : > { %1606 = vrot.lane.b32.xlu2 %v1550_v59, %s1849_s7 }
 0x1bc   : > { %1646 = vrot.lane.b32.xlu0 %v1645_v15, %s1849_s7  ;;  %1631 = vrot.lane.b32.xlu1 %v1550_v59, %s1851_s26 }
 0x1bd   : > { %1621 = vrot.lane.b32.xlu2 %v1550_v59, %s1850_s16 }
 0x1c4   : > { %1656 = vrot.lane.b32.xlu0 %v1645_v15, %s1850_s16  ;;  %1651 = vrot.lane.b32.xlu1 %v1650_v1, %s1852_s19  ;;  %s2629_s16 = scalar_lea.vmem [#allocation10], %s1343_s27 }
 0x1c5   : > { %1636 = vrot.lane.b32.xlu2 %v1645_v15, %s1848_s20  ;;  %s1341_s20 = smul.u32 24, %s1913_s25 }
 0x1cc   : > { %1032 = vperm.xlu0 %1548, %v1028_v7   ;;  %1661 = vrot.lane.b32.xlu1 %v1645_v15, %s1851_s26  ;;  %s1220_s26 = scalar_lea.hbm %s2679_s6, %s1341_s20 }
 0x1cd   : > { %1641 = vrot.lane.b32.xlu2 %v1640_v25, %s1852_s19  ;;  %s1223_s29 = sshll.u32 %s1220_s26, 4  ;;  %s1224_s29 = int_to_ptr.hbm [resolvable:$true] %s1223_s29 }
 0x1ce   : > { %s1780_s15 = sshra.s32 %s1224_s29, 4  ;;  %s1781_s15 = int_to_ptr.hbm [resolvable:$true] %s1780_s15 }
 0x1cf   : > { %s1782_s18 = scalar_lea.hbm %s1781_s15, 48  ;;  %p1787_p0 = scmp.lt.s32.totalorder %s1781_s15, %s2679_s6 }
 0x1d0   : > { %p1783_p4 = scmp.ne.s32.totalorder %s1781_s15, %s1782_s18  ;;  %p1788_p7 = scmp.lt.s32.totalorder %s1786_s12, %s1782_s18 }
 0x1d2   : > { %p1784_p6 = pnand %p1783_p4, %p1944_p11  ;;  %p1789_p5 = por %p1788_p7, %p1787_p0 }
 0x1d4   : > { %1037 = vperm.xlu1 %1549, %v1029_v22   ;;  %p1785_p13 = pneg %p1784_p6 }
 0x1d5   : > { %1666 = vrot.lane.b32.xlu2 %v1665_v26, %s1852_s19  ;;  %s1221_s19 = sshll.u32 %s2629_s16, 4  ;;  %s1222_s19 = int_to_ptr.vmem [resolvable:$true] %s1221_s19 }
 0x1d6   : > { %p1790_p8 = pnand %p1789_p5, %p1785_p13 }
 0x1e8   : > { %v1557_v30 = vpop.permute.xlu1 %1556  ;;  %v1562_v47 = vpop.permute.xlu0 %1561 }
 0x1e9   : > { %v1559_v34 = vunpack.i.h.bf16 %v1557_v30  ;;  %v1558_v38 = vunpack.i.l.bf16 %v1557_v30  ;;  %v1564_v51 = vunpack.i.h.bf16 %v1562_v47  ;;  %v1563_v54 = vunpack.i.l.bf16 %v1562_v47 }
 0x1eb   : > { %v936_v45 = vsel %vm481_vm0, %v1558_v38, %v1559_v34  ;;  %v912_v60 = vsel %vm456_vm1, %v1563_v54, %v1564_v51 }
 0x1ee   : > { %v2459_v27 = vpop.permute.xlu2 %1551 }
 0x1ef   : > { %v1554_v33 = vunpack.i.h.bf16 %v2459_v27  ;;  %v1553_v12 = vunpack.i.l.bf16 %v2459_v27 }
 0x1f7   : > { %v2461_v28 = vpop.permute.xlu2 %1566 }
 0x1f8   : > { %v1569_v40 = vunpack.i.h.bf16 %v2461_v28  ;;  %v1568_v46 = vunpack.i.l.bf16 %v2461_v28 }
 0x1fa   : > { %v888_v41 = vsel %vm431_vm2, %v1568_v46, %v1569_v40 }
 0x1ff   : > { %v1587_v32 = vpop.permute.xlu2 %1586 }
 0x200   : > { %v1589_v42 = vunpack.i.h.bf16 %v1587_v32  ;;  %v1588_v43 = vunpack.i.l.bf16 %v1587_v32 }
 0x202   : > { %v937_v44 = vsel %vm481_vm0, %v1588_v43, %v1589_v42 }
 0x203   : > { %1046 = vmatpush.msra.mxu3 %v937_v44 }
 0x205   : > { %1047 = vmatpush.msra.mxu3 %v936_v45 }
 0x207   : > { %v1592_v48 = vpop.permute.xlu2 %1591 }
 0x208   : > { %v1594_v55 = vunpack.i.h.bf16 %v1592_v48  ;;  %v1593_v57 = vunpack.i.l.bf16 %v1592_v48 }
 0x20a   : > { %v913_v58 = vsel %vm456_vm1, %v1593_v57, %v1594_v55 }
 0x20b   : > { %1048 = vmatpush.msra.mxu3 %v913_v58 }
 0x20d   : > { %1049 = vmatpush.msra.mxu3 %v912_v60 }
 0x20e   : > { %v1572_v62 = vpop.permute.xlu0 %1571  ;;  %v2471_v6 = vpop.permute.xlu1 %1576 }
 0x20f   : > { %v1574_v10 = vunpack.i.h.bf16 %v1572_v62  ;;  %v1573_v11 = vunpack.i.l.bf16 %v1572_v62  ;;  %v2473_v21 = vpop.permute.xlu2 %1606  ;;  %v1579_v59 = vunpack.i.h.bf16 %v2471_v6  ;;  %v1578_v2 = vunpack.i.l.bf16 %v2471_v6 }
 0x210   : > { %v1609_v22 = vunpack.i.h.bf16 %v2473_v21  ;;  %v1608_v26 = vunpack.i.l.bf16 %v2473_v21 }
 0x211   : > { %v935_v3 = vsel %vm481_vm0, %v1589_v42, %v1573_v11  ;;  %v939_v36 = vsel %vm481_vm0, %v1573_v11, %v1588_v43  ;;  %v934_v37 = vsel %vm481_vm0, %v1559_v34, %v1574_v10  ;;  %v938_v39 = vsel %vm481_vm0, %v1574_v10, %v1558_v38 }
 0x212   : > { %1092 = vmatpush.msrb.mxu2 %v935_v3  ;;  %1138 = vmatpush.msrb.mxu0 %v939_v36  ;;  %v861_v15 = vsel %vm400_vm3, %v1579_v59, %v1578_v2  ;;  %v836_v43 = vsel %vm375_vm4, %v1609_v22, %v1608_v26  ;;  %v970_v36 = vld [vmem:[#allocation9] sm:$0xff] }
 0x214   : > { %1093 = vmatpush.msrb.mxu2 %v934_v37  ;;  %1139 = vmatpush.msrb.mxu0 %v938_v39 }
 0x216   : > { %v1582_v49 = vpop.permute.xlu0 %1581  ;;  %v1597_v50 = vpop.permute.xlu1 %1596 }
 0x217   : > { %v1584_v61 = vunpack.i.h.bf16 %v1582_v49  ;;  %v1583_v63 = vunpack.i.l.bf16 %v1582_v49  ;;  %v1599_v5 = vunpack.i.h.bf16 %v1597_v50  ;;  %v1598_v23 = vunpack.i.l.bf16 %v1597_v50  ;;  %v2485_v31 = vpop.permute.xlu2 %1621 }
 0x218   : > { %v1624_v34 = vunpack.i.h.bf16 %v2485_v31  ;;  %v1623_v44 = vunpack.i.l.bf16 %v2485_v31 }
 0x219   : > { %v889_v53 = vsel %vm431_vm2, %v1598_v23, %v1599_v5  ;;  %v911_v24 = vsel %vm456_vm1, %v1594_v55, %v1583_v63  ;;  %v915_v14 = vsel %vm456_vm1, %v1583_v63, %v1593_v57  ;;  %v910_v35 = vsel %vm456_vm1, %v1564_v51, %v1584_v61 }
 0x21a   : > { %1050 = vmatpush.msra.mxu3 %v889_v53  ;;  %1094 = vmatpush.msrb.mxu2 %v911_v24  ;;  %v914_v56 = vsel %vm456_vm1, %v1584_v61, %v1563_v54 }
 0x21b   : > { %1140 = vmatpush.msrb.mxu0 %v915_v14 }
 0x21c   : > { %1051 = vmatpush.msra.mxu3 %v888_v41  ;;  %1095 = vmatpush.msrb.mxu2 %v910_v35 }
 0x21d   : > { %1141 = vmatpush.msrb.mxu0 %v914_v56 }
 0x21e   : > { %v1612_v0 = vpop.permute.xlu0 %1611  ;;  %v2501_v8 = vpop.permute.xlu1 %1601  ;;  %1052 = vmatpush.msra.mxu3 %v2412_v29 }
 0x21f   : > { %v1614_v19 = vunpack.i.h.bf16 %v1612_v0  ;;  %v1613_v18 = vunpack.i.l.bf16 %v1612_v0  ;;  %v1637_v13 = vpop.permute.xlu2 %1636  ;;  %v1604_v1 = vunpack.i.h.bf16 %v2501_v8  ;;  %v1603_v7 = vunpack.i.l.bf16 %v2501_v8 }
 0x220   : > { %1053 = vmatpush.msra.mxu3 %v2399_v9  ;;  %v860_v9 = vsel %vm400_vm3, %v1554_v33, %v1553_v12  ;;  %v1638_v30 = vunpack.i.l.bf16 %v1637_v13  ;;  %v1639_v45 = vunpack.i.h.bf16 %v1637_v13 }
 0x221   : > { %v887_v25 = vsel %vm431_vm2, %v1599_v5, %v1613_v18  ;;  %v891_v29 = vsel %vm431_vm2, %v1613_v18, %v1598_v23  ;;  %v886_v27 = vsel %vm431_vm2, %v1569_v40, %v1614_v19  ;;  %v890_v28 = vsel %vm431_vm2, %v1614_v19, %v1568_v46  ;;  %v971_v19 = vld [vmem:[#allocation9 + $0x8] sm:$0xff] }
 0x222   : > { %1054 = vmatpush.msra.mxu3 %v861_v15  ;;  %1096 = vmatpush.msrb.mxu2 %v887_v25  ;;  %v837_v32 = vsel %vm375_vm4, %v1604_v1, %v1603_v7  ;;  %v859_v57 = vsel %vm400_vm3, %v1578_v2, %v1638_v30  ;;  %v856_v58 = vsel %vm400_vm3, %v1639_v45, %v1554_v33  ;;  %v972_v33 = vld [vmem:[#allocation9 + $0x10] sm:$0xff] }
 0x223   : > { %1142 = vmatpush.msrb.mxu0 %v891_v29 }
 0x224   : > { %1055 = vmatpush.msra.mxu3 %v860_v9  ;;  %1097 = vmatpush.msrb.mxu2 %v886_v27  ;;  %v973_v27 = vld [vmem:[#allocation9 + $0x18] sm:$0xff] }
 0x225   : > { %1143 = vmatpush.msrb.mxu0 %v890_v28 }
 0x226   : > { %v2526_v38 = vpop.permute.xlu0 %1626  ;;  %v2528_v42 = vpop.permute.xlu1 %1616  ;;  %1056 = vmatpush.msra.mxu3 %v837_v32  ;;  %1098 = vmatpush.msrb.mxu2 %v2423_v20 }
 0x227   : > { %v1619_v47 = vunpack.i.h.bf16 %v2528_v42  ;;  %v1618_v48 = vunpack.i.l.bf16 %v2528_v42  ;;  %1144 = vmatpush.msrb.mxu0 %v2414_v17  ;;  %v1629_v51 = vunpack.i.h.bf16 %v2526_v38  ;;  %v1628_v54 = vunpack.i.l.bf16 %v2526_v38  ;;  %v2540_v20 = vpop.permute.xlu2 %1641 }
 0x228   : > { %1057 = vmatpush.msra.mxu3 %v836_v43  ;;  %1099 = vmatpush.msrb.mxu2 %v2401_v4  ;;  %v857_v17 = vsel %vm400_vm3, %v1638_v30, %v1579_v59  ;;  %v812_v4 = vsel %vm350_vm5, %v1624_v34, %v1623_v44  ;;  %v1644_v41 = vunpack.i.h.bf16 %v2540_v20  ;;  %v1643_v35 = vunpack.i.l.bf16 %v2540_v20 }
 0x229   : > { %1145 = vmatpush.msrb.mxu0 %v2407_v52  ;;  %v813_v55 = vsel %vm350_vm5, %v1619_v47, %v1618_v48  ;;  %v858_v52 = vsel %vm400_vm3, %v1553_v12, %v1639_v45  ;;  %v789_v60 = vsel %vm325_vm6, %v1629_v51, %v1628_v54 }
 0x22a   : > { %1058 = vmatpush.msra.mxu3 %v813_v55  ;;  %1100 = vmatpush.msrb.mxu2 %v859_v57  ;;  %v958_v13 = vsel %vm506_vm7, %v1643_v35, %v1644_v41 }
 0x22b   : > { %1146 = vmatpush.msrb.mxu0 %v857_v17 }
 0x22c   : > { %1059 = vmatpush.msra.mxu3 %v812_v4  ;;  %1101 = vmatpush.msrb.mxu2 %v858_v52 }
 0x22d   : > { %1147 = vmatpush.msrb.mxu0 %v856_v58  ;;  %v1671_v58 = vld [vmem:[%s1998_s14 + $0x8] sm:$0xff] }
 0x22e   : > { %v1647_v62 = vpop.permute.xlu0 %1646  ;;  %v2565_v6 = vpop.permute.xlu1 %1631  ;;  %1060 = vmatpush.msra.mxu3 %v789_v60 }
 0x22f   : > { %v1649_v10 = vunpack.i.h.bf16 %v1647_v62  ;;  %v1648_v11 = vunpack.i.l.bf16 %v1647_v62  ;;  %v1634_v21 = vunpack.i.h.bf16 %v2565_v6  ;;  %v1633_v3 = vunpack.i.l.bf16 %v2565_v6  ;;  %v1667_v46 = vpop.permute.xlu2 %1666 }
 0x230   : > { %v1668_v61 = vunpack.i.l.bf16 %v1667_v46  ;;  %v1669_v59 = vunpack.i.h.bf16 %v1667_v46 }
 0x231   : > { %v788_v37 = vsel %vm325_vm6, %v1634_v21, %v1633_v3  ;;  %v835_v39 = vsel %vm375_vm4, %v1603_v7, %v1648_v11  ;;  %v833_v40 = vsel %vm375_vm4, %v1648_v11, %v1604_v1  ;;  %v834_v49 = vsel %vm375_vm4, %v1608_v26, %v1649_v10 }
 0x232   : > { %1061 = vmatpush.msra.mxu3 %v788_v37  ;;  %1102 = vmatpush.msrb.mxu2 %v835_v39  ;;  %v832_v50 = vsel %vm375_vm4, %v1649_v10, %v1609_v22  ;;  %v960_v18 = vsel %vm506_vm7, %v1669_v59, %v1643_v35  ;;  %v962_v22 = vsel %vm506_vm7, %v1644_v41, %v1669_v59  ;;  %v1672_v10 = vld [vmem:[%s1998_s14 + $0x10] sm:$0xff]  ;;  %v1674_v41 = vld [vmem:[%s1998_s14 + $0x20] sm:$0xff] }
 0x233   : > { %1148 = vmatpush.msrb.mxu0 %v833_v40  ;;  %1062 = vmatmul.f32.vlgmr.msra.gmra.mxu3 %v970_v36 }
 0x234   : > { %1103 = vmatpush.msrb.mxu2 %v834_v49 }
 0x235   : > { %1149 = vmatpush.msrb.mxu0 %v832_v50 }
 0x236   : > { %v1657_v63 = vpop.permute.xlu0 %1656  ;;  %v1652_v5 = vpop.permute.xlu1 %1651 }
 0x237   : > { %v1659_v23 = vunpack.i.h.bf16 %v1657_v63  ;;  %v1658_v53 = vunpack.i.l.bf16 %v1657_v63  ;;  %v1654_v24 = vunpack.i.h.bf16 %v1652_v5  ;;  %v1653_v14 = vunpack.i.l.bf16 %v1652_v5  ;;  %v1673_v63 = vld [vmem:[%s1998_s14 + $0x18] sm:$0xff] }
 0x239   : > { %v961_v2 = vsel %vm506_vm7, %v1668_v61, %v1653_v14  ;;  %v811_v56 = vsel %vm350_vm5, %v1618_v48, %v1658_v53  ;;  %v959_v0 = vsel %vm506_vm7, %v1653_v14, %v1654_v24  ;;  %v809_v8 = vsel %vm350_vm5, %v1658_v53, %v1619_v47 }
 0x23a   : > { %1083 = vmatpush.msrb.mxu3 %v961_v2  ;;  %1104 = vmatpush.msrb.mxu2 %v811_v56  ;;  %v810_v12 = vsel %vm350_vm5, %v1623_v44, %v1659_v23  ;;  %v808_v15 = vsel %vm350_vm5, %v1659_v23, %v1624_v34  ;;  %v963_v1 = vsel %vm506_vm7, %v1654_v24, %v1668_v61  ;;  %v1675_v2 = vld [vmem:[%s1998_s14 + $0x28] sm:$0xff] }
 0x23b   : > { %1129 = vmatpush.msra.mxu1 %v959_v0  ;;  %1150 = vmatpush.msrb.mxu0 %v809_v8 }
 0x23c   : > { %1065 = vmatmul.f32.gmra.mxu3 %v972_v33  ;;  %1105 = vmatpush.msrb.mxu2 %v810_v12 }
 0x23d   : > { %1084 = vmatpush.msrb.mxu3 %v960_v18  ;;  %1130 = vmatpush.msra.mxu1 %v958_v13 }
 0x23e   : > { %1151 = vmatpush.msrb.mxu0 %v808_v15  ;;  %1333 = vmatmul.msk.f32.vlgmr.msra.gmra.mxu1 %vm589_vm8, %v971_v19  ;;  %v1662_v7 = vpop.permute.xlu1 %1661  ;;  %v1033_v16 = vpop.permute.xlu0 %1032 }
 0x23f   : > { %1175 = vmatpush.msrb.mxu1 %v963_v1  ;;  %v1664_v25 = vunpack.i.h.bf16 %v1662_v7  ;;  %v1663_v29 = vunpack.i.l.bf16 %v1662_v7 }
 0x241   : > { %1176 = vmatpush.msrb.mxu1 %v962_v22  ;;  %v787_v31 = vsel %vm325_vm6, %v1628_v54, %v1663_v29  ;;  %v785_v26 = vsel %vm325_vm6, %v1663_v29, %v1629_v51  ;;  %v786_v9 = vsel %vm325_vm6, %v1633_v3, %v1664_v25  ;;  %v784_v28 = vsel %vm325_vm6, %v1664_v25, %v1634_v21  ;;  %v1670_v54 = vld [vmem:[%s1998_s14] sm:$0xff] }
 0x242   : > { %1106 = vmatpush.msrb.mxu2 %v787_v31  ;;  %1152 = vmatpush.msrb.mxu0 %v785_v26 }
 0x244   : > { %1331 = vmatmul.msk.f32.vlgmr.msrb.gmra.mxu3 %vm589_vm8, %v971_v19  ;;  %1107 = vmatpush.msrb.mxu2 %v786_v9 }
 0x245   : > { %1153 = vmatpush.msrb.mxu0 %v784_v28  ;;  %1108 = vmatmul.f32.vlgmr.msrb.gmra.mxu2 %v970_v36 }
 0x246   : > { %1334 = vmatmul.msk.f32.gmra.mxu1 %vm589_vm8, %v973_v27  ;;  %1154 = vmatmul.f32.vlgmr.msrb.gmra.mxu0 %v970_v36  ;;  %v1038_v52 = vpop.permute.xlu1 %1037 }
 0x24c   : > { %1332 = vmatmul.msk.f32.gmra.mxu3 %vm589_vm8, %v973_v27 }
 0x24d   : > { %1111 = vmatmul.f32.gmra.mxu2 %v972_v33 }
 0x24e   : > { %1157 = vmatmul.f32.gmra.mxu0 %v972_v33  ;;  %1335 = vmatmul.msk.f32.vlgmr.msrb.gmra.mxu1 %vm589_vm8, %v971_v19 }
 0x256   : > { %1336 = vmatmul.msk.f32.gmra.mxu1 %vm589_vm8, %v973_v27 }
 0x2b6   : > { %v1063_v30 = vpop.f32.mrf.mxu3 }
 0x2b7   : > { %v1064_v43 = vadd.f32 %v1063_v30, %v1033_v16 }
 0x2bb   : > { %v1132_v32 = vpop.f32.mrf.mxu1 }
 0x2bf   : > { %v1066_v34 = vpop.f32.mrf.mxu3 }
 0x2c0   : > { %v1067_v62 = vadd.f32 %v1066_v34, %v1038_v52 }
 0x2c3   : > { %v1135_v38 = vpop.f32.mrf.mxu1  ;;  %v1155_v42 = vpop.f32.mrf.mxu0 }
 0x2c4   : > { %v1156_v51 = vadd.f32 %v1155_v42, %v1033_v16 }
 0x2c7   : > { %v1086_v44 = vpop.f32.mrf.mxu3 }
 0x2c8   : > { %v1087_v45 = vadd.f32 %v1086_v44, %v1064_v43  ;;  %v1109_v47 = vpop.f32.mrf.mxu2 }
 0x2c9   : > { %v1110_v48 = vadd.f32 %v1109_v47, %v1033_v16 }
 0x2ca   : > { %v1184_v20 = vadd.f32 %v1670_v54, %v1087_v45 }
 0x2cb   : > { %v1133_v55 = vadd.f32 %v1132_v32, %v1110_v48  ;;  %v1178_v57 = vpop.f32.mrf.mxu1  ;;  %v1158_v3 = vpop.f32.mrf.mxu0 }
 0x2cc   : > { %v1190_v17 = vmax.f32 %v1184_v20, 0.0  ;;  %v1179_v4 = vadd.f32 %v1178_v57, %v1156_v51  ;;  %v1159_v50 = vadd.f32 %v1158_v3, %v1038_v52 }
 0x2cd   : > { %v1185_v60 = vadd.f32 %v1671_v58, %v1133_v55 }
 0x2ce   : > { %v1196_v6 = vmin.f32 %v1190_v17, 20.0  ;;  %v1186_v11 = vadd.f32 %v1672_v10, %v1179_v4 }
 0x2cf   : > { %v1191_v21 = vmax.f32 %v1185_v60, 0.0  ;;  %v1089_v36 = vpop.f32.mrf.mxu3 }
 0x2d0   : > { %1202 = vst [vmem:[%s2629_s16] sm:$0xff] %v1196_v6  ;;  %v1192_v37 = vmax.f32 %v1186_v11, 0.0  ;;  %v1090_v39 = vadd.f32 %v1089_v36, %v1067_v62  ;;  %v1112_v40 = vpop.f32.mrf.mxu2 }
 0x2d1   : > { %v1197_v46 = vmin.f32 %v1191_v21, 20.0  ;;  %v1113_v49 = vadd.f32 %v1112_v40, %v1038_v52 }
 0x2d2   : > { %v1198_v61 = vmin.f32 %v1192_v37, 20.0  ;;  %v1187_v5 = vadd.f32 %v1673_v63, %v1090_v39 }
 0x2d3   : > { %1203 = vst [vmem:[%s2629_s16 + $0x8] sm:$0xff] %v1197_v46  ;;  %v1136_v23 = vadd.f32 %v1135_v38, %v1113_v49  ;;  %v1181_v53 = vpop.f32.mrf.mxu1 }
 0x2d4   : > { %1204 = vst [vmem:[%s2629_s16 + $0x10] sm:$0xff] %v1198_v61  ;;  %v1193_v24 = vmax.f32 %v1187_v5, 0.0  ;;  %v1182_v14 = vadd.f32 %v1181_v53, %v1159_v50 }
 0x2d5   : > { %v1188_v35 = vadd.f32 %v1674_v41, %v1136_v23 }
 0x2d6   : > { %v1199_v59 = vmin.f32 %v1193_v24, 20.0  ;;  %v1189_v56 = vadd.f32 %v1675_v2, %v1182_v14 }
 0x2d7   : > { %v1194_v0 = vmax.f32 %v1188_v35, 0.0 }
 0x2d8   : > { %1205 = vst [vmem:[%s2629_s16 + $0x18] sm:$0xff] %v1199_v59  ;;  %v1195_v8 = vmax.f32 %v1189_v56, 0.0 }
 0x2d9   : > { %v1200_v33 = vmin.f32 %v1194_v0, 20.0 }
 0x2da   : > { %v1201_v12 = vmin.f32 %v1195_v8, 20.0 }
 0x2db   : > { %1206 = vst [vmem:[%s2629_s16 + $0x20] sm:$0xff] %v1200_v33 }
 0x2dc   : > { %1207 = vst [vmem:[%s2629_s16 + $0x28] sm:$0xff] %v1201_v12 }
 0x2dd   : > { %1793 = shalt.err (!%p1790_p8)
}
 0x2de   : > { %s1854_s17 = smov 384   ;;  %s1855_s4 = smov 768  }
 0x2df   : > { %s1856_s8 = smov 24  }
 0x2e0   : > { %1354 = dma.vmem_to_hbm [thread:$0]  (%p1944_p11), %s1222_s19, 768, %s1224_s29, %s1209_s13, %s1854_s17, %s1855_s4, %s1856_s8  }
 0x2e1 PF: > { %s1238_s11 = sand.u32 1, %s1824_s21   ;;  %p2700_p9 = scmp.ge.s32.totalorder %s1836_s24, 2 }
 0x2e2   : > { %s1239_s7 = scalar_lea.sflag [#allocation6], %s1238_s11 }
 0x2e3   : > { %p1368_p10 = pnand %p2700_p9, %p1948_p12 }
 0x2e5   : > { %p1369_p1 = pneg %p1368_p10 }
 0x2e7   : > { %1819 = dma.done.wait (%p1369_p1), %s1239_s7, 768  }
 0x2e8   : > { %1821 = vsyncadd (%p1369_p1), %s1239_s7, 4294966528  ;;  %s2701_s24 = sld [smem:[#allocation14_spill]]  ;;  %s2703_s21 = smov %s1828_s22 }
 0x2e9   : > { %s2702_s20 = sld [smem:[#allocation15_spill]]  ;;  %s2704_s22 = smov %s1832_s23 }
 0x2ee   : > { %p20_p2 = scmp.ge.s32.totalorder %s2701_s24, 4  }
 0x2ef   : > { %s2705_s23 = smov %s2702_s20 }
 0x2f0   :  { %22 = sbr.rel (!%p20_p2) target bundleno = 9 (0x9), region = 97 }
 0x2f5   :  { %1245 = vsyncpa [#allocation5], 1 }
 0x2f6   :  { %1247 = vsyncpa [#allocation5 + $0x1], 1 }
 0x2f7   :  { %1248 = vsyncpa [#allocation8], 1 }
 0x2f8   :  { %1249 = vsyncpa [#allocation6], 1 }
 0x2f9   :  { %1251 = vsyncpa [#allocation6 + $0x1], 1 }

</bundles_post_ra>
